<compile_context>
chip_gen: v5e
topology: v5e:2x2
jax: 0.10.0
libtpu: 0.0.40
codegen_flags: <defaults>
</compile_context>

<pallas_src>
import functools

import jax
import jax.numpy as jnp
from jax.experimental import pallas as pl
from jax.experimental.pallas import tpu as pltpu

EPS = 0.001


def _round_up(x, m):
    return ((x + m - 1) // m) * m


def _sublane_multiple(dtype):
    # sublane tiling multiple by element width: f32 -> 8, bf16 -> 16, int8 -> 32
    return {4: 8, 2: 16, 1: 32}.get(jnp.dtype(dtype).itemsize, 8)


def _padded_block_bytes(rows, cols, dtype):
    itemsize = jnp.dtype(dtype).itemsize
    return _round_up(rows, _sublane_multiple(dtype)) * _round_up(cols, 128) * itemsize


def _choose_fold(n, d):
    """Power-of-two fold F (dividing D) so rows = N*F fill sublanes without
    shrinking the lane (folded-D) axis below a useful width."""
    f = 1
    while d % (2 * f) == 0:
        rows = n * 2 * f
        cols = d // (2 * f)
        if rows <= 8 and cols >= 128:        # always fold up to 8 rows
            f *= 2
        elif rows <= 256 and cols >= 2048:   # keep folding only while D stays wide
            f *= 2
        else:
            break
    return f


def _choose_tile(d2, cap=4096):
    """Pick tile_d: a multiple-of-128 divisor of d2 (<= cap, aiming for >= 4
    tiles for pipeline overlap / clean 2-way partition).  Returns (tile_d,
    need_mask)."""
    if d2 % 128 == 0:
        upper = min(cap, max(128, (d2 // 4) // 128 * 128))
        for cand in range(upper, 127, -128):
            if d2 % cand == 0:
                return cand, False
        return 128, False
    if d2 <= cap:
        return d2, False      # single full-width block (block == full dim)
    return cap, True          # ragged last tile -> masked fallback path


def _bce_dice_jacc_partials_kernel(
    x_ref, t_ref, bce_ref, inter_ref, psum_ref, tsum_ref,
    *, tiles_per_part, tile_d, d_valid, need_mask,
):
    k = pl.program_id(1)

    # ---- init resident output accumulators at the start of each partition ----
    @pl.when(k == 0)
    def _():
        z = jnp.zeros_like(bce_ref)
        bce_ref[...] = z
        inter_ref[...] = z
        psum_ref[...] = z
        tsum_ref[...] = z

    x = x_ref[...].astype(jnp.float32)   # (rows, tile_d) logits
    t = t_ref[...].astype(jnp.float32)   # (rows, tile_d) targets

    if need_mask:
        # Mask BEFORE the transcendentals: OOB pad lanes may hold garbage.
        g = pl.program_id(0) * tiles_per_part + k        # global D-tile index
        col = jax.lax.broadcasted_iota(jnp.int32, x.shape, 1) + g * tile_d
        valid = col < d_valid
        mask_f = valid.astype(jnp.float32)
        x = jnp.where(valid, x, 0.0)
        t = jnp.where(valid, t, 0.0)

    # ---- shared transcendental: e = exp(-|x|) ----
    e = jnp.exp(-jnp.abs(x))
    one_plus_e = 1.0 + e
    r = pl.reciprocal(one_plus_e, approx=True)
    r = r * (2.0 - one_plus_e * r)            # one Newton step -> ~f32 exact
    sig = jnp.where(x >= 0, r, 1.0 - r)       # sigmoid(x), no extra multiply
    # BCEWithLogits, numerically stable: max(x,0) - x*t + log(1 + exp(-|x|))
    bce = jnp.maximum(x, 0.0) - x * t + jnp.log1p(e)

    if need_mask:
        # zero padded-lane contributions (log(2) / 0.5 per pad otherwise)
        sig = sig * mask_f
        bce = bce * mask_f

    if tile_d % 128 == 0:
        # 128-lane chunk VALU adds into lane-dense accumulators; the full
        # cross-lane (XLU) reduce is deferred to the wrapper finalize.
        s0, t0 = sig[:, 0:128], t[:, 0:128]
        bce_p, inter_p, psum_p, tsum_p = bce[:, 0:128], s0 * t0, s0, t0
        for j in range(1, tile_d // 128):
            lo = j * 128
            sj, tj = sig[:, lo:lo + 128], t[:, lo:lo + 128]
            bce_p = bce_p + bce[:, lo:lo + 128]
            inter_p = inter_p + sj * tj
            psum_p = psum_p + sj
            tsum_p = tsum_p + tj
        bce_ref[0] += bce_p
        inter_ref[0] += inter_p
        psum_ref[0] += psum_p
        tsum_ref[0] += tsum_p
    else:
        # odd lane widths (rare): fall back to in-kernel lane reduces
        bce_ref[0, :, :1] += jnp.sum(bce, axis=1, keepdims=True)
        inter_ref[0, :, :1] += jnp.sum(sig * t, axis=1, keepdims=True)
        psum_ref[0, :, :1] += jnp.sum(sig, axis=1, keepdims=True)
        tsum_ref[0, :, :1] += jnp.sum(t, axis=1, keepdims=True)


def bce_dice_jaccard_loss(logits_nchw, target_nchw, weights, *, tile_d=None):
    """weights: dict with keys 'bce', 'dice', 'jacc' (static Python floats).
    A weight of exactly 0.0 (or a missing key) drops that term, mirroring the
    PyTorch module's `if not v: continue`.

    `target_nchw` may be any dtype (e.g. bf16/int8/bool binary mask) — it is
    cast to f32 inside the kernel; narrow dtypes cut HBM read traffic."""
    n = logits_nchw.shape[0]
    d = 1
    for s in logits_nchw.shape[1:]:
        d *= s

    # Fold per-sample elements into sublanes: (N, D) -> (N*F, D/F), contiguous.
    fold = _choose_fold(n, d)
    rows = n * fold
    d2 = d // fold
    x2 = logits_nchw.reshape(rows, d2)
    t2 = target_nchw.reshape(rows, d2)

    if tile_d is None:
        tile_d, need_mask = _choose_tile(d2)
    else:
        tile_d = min(int(tile_d), d2)
        need_mask = (d2 % tile_d) != 0
    num_tiles = pl.cdiv(d2, tile_d)

    # 2-way "parallel" split of the D tiles (both v7x TensorCores; harmless on
    # single-TC chips) when it divides evenly.
    num_parts = 2 if (num_tiles >= 2 and num_tiles % 2 == 0) else 1
    tiles_per_part = num_tiles // num_parts

    # VMEM accounting WITH sublane padding (the previous version's blind spot).
    pipeline_bytes = 2 * (_padded_block_bytes(rows, tile_d, x2.dtype)
                          + _padded_block_bytes(rows, tile_d, t2.dtype))
    out_bytes = 2 * 4 * _padded_block_bytes(rows, 128, jnp.float32)
    vmem_limit = int(min(48 << 20, max(32 << 20, 2 * (pipeline_bytes + out_bytes))))

    kernel = functools.partial(
        _bce_dice_jacc_partials_kernel,
        tiles_per_part=tiles_per_part,
        tile_d=tile_d,
        d_valid=d2,
        need_mask=need_mask,
    )

    part_shape = jax.ShapeDtypeStruct((num_parts, rows, 128), jnp.float32)
    out_spec = pl.BlockSpec((1, rows, 128), lambda p, k: (p, 0, 0))
    in_spec = pl.BlockSpec((rows, tile_d),
                           lambda p, k, tpp=tiles_per_part: (0, p * tpp + k))

    bce_p, inter_p, psum_p, tsum_p = pl.pallas_call(
        kernel,
        out_shape=(part_shape, part_shape, part_shape, part_shape),
        grid_spec=pltpu.PrefetchScalarGridSpec(
            num_scalar_prefetch=0,
            grid=(num_parts, tiles_per_part),
            in_specs=[in_spec, in_spec],
            out_specs=[out_spec, out_spec, out_spec, out_spec],
        ),
        compiler_params=pltpu.CompilerParams(
            dimension_semantics=("parallel", "arbitrary"),
            vmem_limit_bytes=vmem_limit,
        ),
    )(x2, t2)

    # ---- wrapper-side finalize: O(N) scalars, free in XLA ----
    w_bce = float(weights.get("bce", 0.0) or 0.0)
    w_dice = float(weights.get("dice", 0.0) or 0.0)
    w_jacc = float(weights.get("jacc", 0.0) or 0.0)

    def per_sample(a):
        return jnp.sum(a, axis=(0, 2)).reshape(n, fold).sum(axis=1)   # (n,)

    inter = per_sample(inter_p)
    psum = per_sample(psum_p)
    tsum = per_sample(tsum_p)

    loss = jnp.float32(0.0)
    if w_bce:
        bce = jnp.sum(bce_p) / jnp.float32(n * d)           # mean over all elements
        loss = loss + w_bce * bce
    if w_jacc:
        jacc_scores = (inter + EPS) / (psum + tsum - inter + EPS)
        jacc = jnp.clip(jnp.sum(jacc_scores) / n, 0.0, 1.0)
        loss = loss + w_jacc * (1.0 - jacc)
    if w_dice:
        dice_scores = (2.0 * inter + EPS) / (psum + tsum + EPS)
        dice = jnp.clip(jnp.sum(dice_scores) / n, 0.0, 1.0)
        loss = loss + w_dice * (1.0 - dice)
    return loss


def _reference(logits, target, weights):
    """Plain-JAX reference mirroring the PyTorch module (for sanity check)."""
    n = logits.shape[0]
    x = logits.reshape(n, -1).astype(jnp.float32)
    t = target.reshape(n, -1).astype(jnp.float32)
    bce = jnp.mean(jnp.maximum(x, 0.0) - x * t + jnp.log1p(jnp.exp(-jnp.abs(x))))
    sig = jax.nn.sigmoid(x)
    inter = jnp.sum(sig * t, axis=1)
    psum = jnp.sum(sig, axis=1)
    tsum = jnp.sum(t, axis=1)
    dice = jnp.clip(jnp.mean((2.0 * inter + EPS) / (psum + tsum + EPS)), 0.0, 1.0)
    jacc = jnp.clip(jnp.sum((inter + EPS) / (psum + tsum - inter + EPS)) / n, 0.0, 1.0)
    return (weights["bce"] * bce
            + weights["jacc"] * (1.0 - jacc)
            + weights["dice"] * (1.0 - dice))


if __name__ == "__main__":
    key = jax.random.PRNGKey(0)
    k1, k2 = jax.random.split(key)

    # NCHW, small shapes: batch=2, channels=4, spatial=16x16
    x = jax.random.normal(k1, (2, 4, 16, 16), dtype=jnp.float32)              # logits
    tgt = (jax.random.uniform(k2, (2, 4, 16, 16)) > 0.5).astype(jnp.float32)  # binary mask

    weights = {"bce": 0.5, "dice": 0.3, "jacc": 0.2}

    # Binary mask is exact in bf16 -> pass the narrower dtype (HBM-bytes lever).
    loss = bce_dice_jaccard_loss(x, tgt.astype(jnp.bfloat16), weights)
    loss = jax.block_until_ready(loss)

    ref = _reference(x, tgt, weights)
    assert jnp.allclose(loss, ref, rtol=1e-4, atol=1e-5), (loss, ref)

    print("KERNEL_OK")
</pallas_src>

<mosaic_0001>
module attributes {stable_mosaic.version = 11 : i64} {
  func.func @_bce_dice_jacc_partials_kernel(%arg0: i32, %arg1: i32, %arg2: memref<8x128xf32, #tpu.memory_space<vmem>>, %arg3: memref<8x128xbf16, #tpu.memory_space<vmem>>, %arg4: memref<1x8x128xf32, #tpu.memory_space<vmem>>, %arg5: memref<1x8x128xf32, #tpu.memory_space<vmem>>, %arg6: memref<1x8x128xf32, #tpu.memory_space<vmem>>, %arg7: memref<1x8x128xf32, #tpu.memory_space<vmem>>) attributes {dimension_semantics = [#tpu.dimension_semantics<parallel>, #tpu.dimension_semantics<arbitrary>], iteration_bounds = array<i64: 2, 1>, scalar_prefetch = 0 : i64, scratch_operands = 0 : i64, tpu.core_type = #tpu.core_type<tc>, window_params = [{transform_indices = @transform_0, window_bounds = array<i64: 8, 128>}, {transform_indices = @transform_1, window_bounds = array<i64: 8, 128>}, {transform_indices = @transform_2, window_bounds = array<i64: 1, 8, 128>}, {transform_indices = @transform_3, window_bounds = array<i64: 1, 8, 128>}, {transform_indices = @transform_4, window_bounds = array<i64: 1, 8, 128>}, {transform_indices = @transform_5, window_bounds = array<i64: 1, 8, 128>}]} {
    %c0_i32 = arith.constant 0 : i32
    %0 = arith.cmpi eq, %arg1, %c0_i32 : i32
    %1 = arith.extui %0 : i1 to i32
    %c0_i32_0 = arith.constant 0 : i32
    %2 = arith.cmpi ne, %1, %c0_i32_0 : i32
    scf.if %2 {
      %cst_33 = arith.constant 0.000000e+00 : f32
      %53 = vector.broadcast %cst_33 : f32 to vector<1x8x128xf32>
      %c0_34 = arith.constant 0 : index
      %c0_35 = arith.constant 0 : index
      %c0_36 = arith.constant 0 : index
      %54 = vector.load %arg4[%c0_34, %c0_35, %c0_36] : memref<1x8x128xf32, #tpu.memory_space<vmem>>, vector<1x8x128xf32>
      tpu.vector_store %arg4[%c0_34, %c0_35, %c0_36], %53 {strides = array<i32>} : memref<1x8x128xf32, #tpu.memory_space<vmem>>, vector<1x8x128xf32>,
      %c0_37 = arith.constant 0 : index
      %c0_38 = arith.constant 0 : index
      %c0_39 = arith.constant 0 : index
      %55 = vector.load %arg5[%c0_37, %c0_38, %c0_39] : memref<1x8x128xf32, #tpu.memory_space<vmem>>, vector<1x8x128xf32>
      tpu.vector_store %arg5[%c0_37, %c0_38, %c0_39], %53 {strides = array<i32>} : memref<1x8x128xf32, #tpu.memory_space<vmem>>, vector<1x8x128xf32>,
      %c0_40 = arith.constant 0 : index
      %c0_41 = arith.constant 0 : index
      %c0_42 = arith.constant 0 : index
      %56 = vector.load %arg6[%c0_40, %c0_41, %c0_42] : memref<1x8x128xf32, #tpu.memory_space<vmem>>, vector<1x8x128xf32>
      tpu.vector_store %arg6[%c0_40, %c0_41, %c0_42], %53 {strides = array<i32>} : memref<1x8x128xf32, #tpu.memory_space<vmem>>, vector<1x8x128xf32>,
      %c0_43 = arith.constant 0 : index
      %c0_44 = arith.constant 0 : index
      %c0_45 = arith.constant 0 : index
      %57 = vector.load %arg7[%c0_43, %c0_44, %c0_45] : memref<1x8x128xf32, #tpu.memory_space<vmem>>, vector<1x8x128xf32>
      tpu.vector_store %arg7[%c0_43, %c0_44, %c0_45], %53 {strides = array<i32>} : memref<1x8x128xf32, #tpu.memory_space<vmem>>, vector<1x8x128xf32>,
    } else {
    }
    %c0 = arith.constant 0 : index
    %c0_1 = arith.constant 0 : index
    %3 = vector.load %arg2[%c0, %c0_1] : memref<8x128xf32, #tpu.memory_space<vmem>>, vector<8x128xf32>
    %c0_2 = arith.constant 0 : index
    %c0_3 = arith.constant 0 : index
    %4 = vector.load %arg3[%c0_2, %c0_3] : memref<8x128xbf16, #tpu.memory_space<vmem>>, vector<8x128xbf16>
    %5 = arith.extf %4 : vector<8x128xbf16> to vector<8x128xf32>
    %6 = math.absf %3 : vector<8x128xf32>
    %cst = arith.constant 0.000000e+00 : f32
    %7 = vector.broadcast %cst : f32 to vector<8x128xf32>
    %8 = arith.subf %7, %6 : vector<8x128xf32>
    %9 = math.exp %8 : vector<8x128xf32>
    %cst_4 = arith.constant 1.000000e+00 : f32
    %10 = vector.broadcast %cst_4 : f32 to vector<8x128xf32>
    %11 = arith.addf %10, %9 : vector<8x128xf32>
    %12 = tpu.reciprocal %11 {approx = true} : vector<8x128xf32> -> vector<8x128xf32>
    %13 = arith.mulf %11, %12 : vector<8x128xf32>
    %cst_5 = arith.constant 2.000000e+00 : f32
    %14 = vector.broadcast %cst_5 : f32 to vector<8x128xf32>
    %15 = arith.subf %14, %13 : vector<8x128xf32>
    %16 = arith.mulf %12, %15 : vector<8x128xf32>
    %cst_6 = arith.constant 0.000000e+00 : f32
    %17 = vector.broadcast %cst_6 : f32 to vector<8x128xf32>
    %18 = arith.cmpf oge, %3, %17 : vector<8x128xf32>
    %cst_7 = arith.constant 1.000000e+00 : f32
    %19 = vector.broadcast %cst_7 : f32 to vector<8x128xf32>
    %20 = arith.subf %19, %16 : vector<8x128xf32>
    %21 = arith.select %18, %16, %20 : vector<8x128xi1>, vector<8x128xf32>
    %cst_8 = arith.constant 0.000000e+00 : f32
    %22 = vector.broadcast %cst_8 : f32 to vector<8x128xf32>
    %23 = arith.maximumf %3, %22 : vector<8x128xf32>
    %24 = arith.mulf %3, %5 : vector<8x128xf32>
    %25 = arith.subf %23, %24 : vector<8x128xf32>
    %26 = math.log1p %9 : vector<8x128xf32>
    %27 = arith.addf %25, %26 : vector<8x128xf32>
    %28 = arith.mulf %21, %5 : vector<8x128xf32>
    %c0_9 = arith.constant 0 : index
    %c0_10 = arith.constant 0 : index
    %c0_11 = arith.constant 0 : index
    %29 = vector.load %arg4[%c0_9, %c0_10, %c0_11] : memref<1x8x128xf32, #tpu.memory_space<vmem>>, vector<1x8x128xf32>
    %30 = vector.shape_cast %29 : vector<1x8x128xf32> to vector<8x128xf32>
    %31 = arith.addf %30, %27 : vector<8x128xf32>
    %c0_12 = arith.constant 0 : index
    %c0_13 = arith.constant 0 : index
    %c0_14 = arith.constant 0 : index
    %32 = vector.load %arg4[%c0_12, %c0_13, %c0_14] : memref<1x8x128xf32, #tpu.memory_space<vmem>>, vector<1x8x128xf32>
    %33 = vector.shape_cast %32 : vector<1x8x128xf32> to vector<8x128xf32>
    %34 = vector.shape_cast %31 : vector<8x128xf32> to vector<1x8x128xf32>
    tpu.vector_store %arg4[%c0_12, %c0_13, %c0_14], %34 {strides = array<i32>} : memref<1x8x128xf32, #tpu.memory_space<vmem>>, vector<1x8x128xf32>,
    %c0_15 = arith.constant 0 : index
    %c0_16 = arith.constant 0 : index
    %c0_17 = arith.constant 0 : index
    %35 = vector.load %arg5[%c0_15, %c0_16, %c0_17] : memref<1x8x128xf32, #tpu.memory_space<vmem>>, vector<1x8x128xf32>
    %36 = vector.shape_cast %35 : vector<1x8x128xf32> to vector<8x128xf32>
    %37 = arith.addf %36, %28 : vector<8x128xf32>
    %c0_18 = arith.constant 0 : index
    %c0_19 = arith.constant 0 : index
    %c0_20 = arith.constant 0 : index
    %38 = vector.load %arg5[%c0_18, %c0_19, %c0_20] : memref<1x8x128xf32, #tpu.memory_space<vmem>>, vector<1x8x128xf32>
    %39 = vector.shape_cast %38 : vector<1x8x128xf32> to vector<8x128xf32>
    %40 = vector.shape_cast %37 : vector<8x128xf32> to vector<1x8x128xf32>
    tpu.vector_store %arg5[%c0_18, %c0_19, %c0_20], %40 {strides = array<i32>} : memref<1x8x128xf32, #tpu.memory_space<vmem>>, vector<1x8x128xf32>,
    %c0_21 = arith.constant 0 : index
    %c0_22 = arith.constant 0 : index
    %c0_23 = arith.constant 0 : index
    %41 = vector.load %arg6[%c0_21, %c0_22, %c0_23] : memref<1x8x128xf32, #tpu.memory_space<vmem>>, vector<1x8x128xf32>
    %42 = vector.shape_cast %41 : vector<1x8x128xf32> to vector<8x128xf32>
    %43 = arith.addf %42, %21 : vector<8x128xf32>
    %c0_24 = arith.constant 0 : index
    %c0_25 = arith.constant 0 : index
    %c0_26 = arith.constant 0 : index
    %44 = vector.load %arg6[%c0_24, %c0_25, %c0_26] : memref<1x8x128xf32, #tpu.memory_space<vmem>>, vector<1x8x128xf32>
    %45 = vector.shape_cast %44 : vector<1x8x128xf32> to vector<8x128xf32>
    %46 = vector.shape_cast %43 : vector<8x128xf32> to vector<1x8x128xf32>
    tpu.vector_store %arg6[%c0_24, %c0_25, %c0_26], %46 {strides = array<i32>} : memref<1x8x128xf32, #tpu.memory_space<vmem>>, vector<1x8x128xf32>,
    %c0_27 = arith.constant 0 : index
    %c0_28 = arith.constant 0 : index
    %c0_29 = arith.constant 0 : index
    %47 = vector.load %arg7[%c0_27, %c0_28, %c0_29] : memref<1x8x128xf32, #tpu.memory_space<vmem>>, vector<1x8x128xf32>
    %48 = vector.shape_cast %47 : vector<1x8x128xf32> to vector<8x128xf32>
    %49 = arith.addf %48, %5 : vector<8x128xf32>
    %c0_30 = arith.constant 0 : index
    %c0_31 = arith.constant 0 : index
    %c0_32 = arith.constant 0 : index
    %50 = vector.load %arg7[%c0_30, %c0_31, %c0_32] : memref<1x8x128xf32, #tpu.memory_space<vmem>>, vector<1x8x128xf32>
    %51 = vector.shape_cast %50 : vector<1x8x128xf32> to vector<8x128xf32>
    %52 = vector.shape_cast %49 : vector<8x128xf32> to vector<1x8x128xf32>
    tpu.vector_store %arg7[%c0_30, %c0_31, %c0_32], %52 {strides = array<i32>} : memref<1x8x128xf32, #tpu.memory_space<vmem>>, vector<1x8x128xf32>,
    return
  }
  func.func @transform_0(%arg0: i32, %arg1: i32) -> (i32, i32) {
    %c1_i32 = arith.constant 1 : i32
    %0 = arith.muli %arg0, %c1_i32 : i32
    %1 = arith.addi %0, %arg1 : i32
    %c0_i32 = arith.constant 0 : i32
    %c0_i32_0 = arith.constant 0 : i32
    return %c0_i32, %1 : i32, i32
  }
  func.func @transform_1(%arg0: i32, %arg1: i32) -> (i32, i32) {
    %c1_i32 = arith.constant 1 : i32
    %0 = arith.muli %arg0, %c1_i32 : i32
    %1 = arith.addi %0, %arg1 : i32
    %c0_i32 = arith.constant 0 : i32
    %c0_i32_0 = arith.constant 0 : i32
    return %c0_i32, %1 : i32, i32
  }
  func.func @transform_2(%arg0: i32, %arg1: i32) -> (i32, i32, i32) {
    %c0_i32 = arith.constant 0 : i32
    %c0_i32_0 = arith.constant 0 : i32
    %c0_i32_1 = arith.constant 0 : i32
    return %arg0, %c0_i32, %c0_i32_0 : i32, i32, i32
  }
  func.func @transform_3(%arg0: i32, %arg1: i32) -> (i32, i32, i32) {
    %c0_i32 = arith.constant 0 : i32
    %c0_i32_0 = arith.constant 0 : i32
    %c0_i32_1 = arith.constant 0 : i32
    return %arg0, %c0_i32, %c0_i32_0 : i32, i32, i32
  }
  func.func @transform_4(%arg0: i32, %arg1: i32) -> (i32, i32, i32) {
    %c0_i32 = arith.constant 0 : i32
    %c0_i32_0 = arith.constant 0 : i32
    %c0_i32_1 = arith.constant 0 : i32
    return %arg0, %c0_i32, %c0_i32_0 : i32, i32, i32
  }
  func.func @transform_5(%arg0: i32, %arg1: i32) -> (i32, i32, i32) {
    %c0_i32 = arith.constant 0 : i32
    %c0_i32_0 = arith.constant 0 : i32
    %c0_i32_1 = arith.constant 0 : i32
    return %arg0, %c0_i32, %c0_i32_0 : i32, i32, i32
  }
}

</mosaic_0001>

<bundles_post_ra>
// kernel: tpu_custom_call.1
= control target key start
LH: loop header
LB: loop body
LE: loop exit
PB: predicated region body
PF: predicated region fallthrough
CT: control target
= control target key end

     0   :  { %s1273_s0 = inlined_call_operand.hbm [shape: f32[8,256], index: 0, kind: input, shape index: {}]   ;;  %s1274_s1 = inlined_call_operand.hbm [shape: bf16[8,256], index: 1, kind: input, shape index: {}]   ;;  %s1275_s2 = inlined_call_operand.hbm [shape: f32[2,8,128], index: 2, kind: output, shape index: {0}]   ;;  %s1276_s3 = inlined_call_operand.hbm [shape: f32[2,8,128], index: 3, kind: output, shape index: {1}]   ;;  %s1277_s4 = inlined_call_operand.hbm [shape: f32[2,8,128], index: 4, kind: output, shape index: {2}]   ;;  %s1278_s5 = inlined_call_operand.hbm [shape: f32[2,8,128], index: 5, kind: output, shape index: {3}]  }
   0x1   :  { %1282 = sst [smem:[#allocation19_spill]] %s1273_s0 }
   0x2   :  { %1283 = sst [smem:[#allocation20_spill]] %s1274_s1 }
   0x3   :  { %1284 = sst [smem:[#allocation21_spill]] %s1278_s5 }
   0x4   :  { %11 = vsyncpa [#allocation3], 0 }
   0x5   :  { %13 = vsyncpa [#allocation3 + $0x1], 0 }
   0x6   :  { %14 = vsyncpa [#allocation6], 0 }
   0x7   :  { %16 = vsyncpa [#allocation6 + $0x1], 0 }
   0x8   :  { %17 = vsyncpa [#allocation4], 0 }
   0x9   :  { %19 = vsyncpa [#allocation4 + $0x1], 0 }
   0xa   :  { %20 = vsyncpa [#allocation9], 0 }
   0xb   :  { %22 = vsyncpa [#allocation9 + $0x1], 0 }
   0xc   :  { %23 = vsyncpa [#allocation12], 0 }
   0xd   :  { %25 = vsyncpa [#allocation12 + $0x1], 0  ;;  %s1034_s18 = smov 0   ;;  %s1036_s19 = smov 0  }
   0xe   :  { %s1038_s20 = smov 0   ;;  %s1040_s21 = smov 0  }
   0xf   :  { %s1042_s22 = smov 0   ;;  %s1044_s23 = smov 0  }
  0x10 LB: > { %s1065_s24 = sadd.s32 4294967295, %s1002_s23   ;;  %s1279_s25 = sadd.s32 4294967294, %s1002_s23   ;;  %s1002_s23 = sphi %s1044_s23, %s31_s23   ;;  %s998_s22 = sphi %s1042_s22, %s1301_s22   ;;  %s994_s21 = sphi %s1040_s21, %s1300_s21   ;;  %s990_s20 = sphi %s1038_s20, %s1299_s20   ;;  %s986_s19 = sphi %s1036_s19, %s1298_s19   ;;  %s982_s18 = sphi %s1034_s18, %s1297_s18  }
  0x11   : > { %s43_s26 = sadd.s32 1, %s998_s22  ;;  %s52_s27 = sadd.s32 1, %s990_s20 }
  0x12   : > { %p45_p0 = scmp.ge.s32.totalorder %s43_s26, 2  ;;  %p59_p1 = scmp.ne.s32.totalorder %s990_s20, %s986_s19 }
  0x13   : > { %p60_p2 = scmp.eq.s32.totalorder %s1002_s23, 0  ;;  %p65_p3 = scmp.ne.s32.totalorder %s986_s19, %s982_s18 }
  0x14   : > { %s1303_s26 = smov (%p45_p0, %s43_s26), 0  ;;  %p66_p5 = scmp.eq.s32.totalorder %s1065_s24, 0 }
  0x15   : > { %1285 = sst [smem:[#allocation18_spill]] %s1303_s26  ;;  %p1077_p4 = por %p60_p2, %p59_p1 }
  0x16   : > { %s49_s29 = ssub.s32 %s998_s22, %s1303_s26  ;;  %p117_p6 = scmp.eq.s32.totalorder %s1065_s24, 1 }
  0x17   : > { %p50_p7 = scmp.eq.s32.totalorder %s49_s29, 0  ;;  %p1085_p8 = por %p66_p5, %p65_p3 }
  0x18   : > { %p1089_p9 = por %p117_p6, %p59_p1  ;;  %p123_p10 = scmp.eq.s32.totalorder %s1279_s25, 1 }
  0x19   : > { %s1096_s7 = scalar_select %p50_p7, %s990_s20, %s52_s27  }
  0x1a   : > { %p1098_p11 = por %p123_p10, %p65_p3  ;;  %p653_p12 = scmp.ge.s32.totalorder %s1002_s23, 2 }
  0x1b   : > { %p707_p13 = scmp.lt.s32.totalorder %s1002_s23, 2  ;;  %s221_s9 = sand.u32 1, %s990_s20  }
  0x1c   : > { %s654_s10 = sshll.u32 %s221_s9, 3  ;;  %s655_s11 = sshll.u32 %s998_s22, 3 }
  0x1d   : > { %s1290_s0 = sld [smem:[#allocation19_spill]]  ;;  %s225_s15 = scalar_lea.vmem [#allocation2], %s654_s10 }
  0x1e   : > { %s234_s16 = sshll.u32 %s225_s15, 4  ;;  %p1111_p0 = pnand %p707_p13, %p1077_p4  ;;  %s235_s16 = int_to_ptr.vmem [resolvable:$true] %s234_s16 }
  0x1f   : > { %p658_p1 = scmp.ge.s32.totalorder %s1002_s23, 1  ;;  %p259_p2 = scmp.lt.s32.totalorder %s1002_s23, 3 }
  0x20   : > { %s222_s29 = scalar_lea.sflag [#allocation3], %s221_s9  ;;  %s656_s12 = sshll.u32 %s221_s9, 2 }
  0x21   : > { %p260_p3 = pnand %p658_p1, %p259_p2  ;;  %s1292_s1 = sld [smem:[#allocation20_spill]] }
  0x22   : > { %s245_s15 = scalar_lea.vmem [#allocation5], %s656_s12  ;;  %s1126_s26 = sand.u32 (!%p260_p3), 1, %s986_s19  }
  0x23   : > { %s230_s14 = scalar_lea.hbm %s1290_s0, %s655_s11  ;;  %s657_s11 = sshll.u32 %s998_s22, 2 }
  0x24   : > { %s232_s17 = sshll.u32 %s230_s14, 4  ;;  %s254_s28 = sshll.u32 %s245_s15, 4  ;;  %s233_s17 = int_to_ptr.hbm [resolvable:$true] %s232_s17  ;;  %s255_s28 = int_to_ptr.vmem [resolvable:$true] %s254_s28 }
  0x25   : > { %690 = dma.hbm_to_vmem [thread:$0]  (!%p1111_p0), %s233_s17, 128, %s235_s16, %s222_s29  }
  0x26   : > { %s242_s0 = scalar_lea.sflag [#allocation6], %s221_s9  ;;  %263 = sbr.rel (%p260_p3) target bundleno = 113 (0x71), region = 28 }
  0x27   : > { %s250_s14 = scalar_lea.hbm %s1292_s1, %s657_s11  ;;  %s1129_s16 = sshll.u32 (!%p260_p3), %s1126_s26, 3 }
  0x28   : > { %s252_s25 = sshll.u32 %s250_s14, 4  ;;  %s266_s17 = scalar_lea.sflag (!%p260_p3), [#allocation3], %s1126_s26  ;;  %s253_s25 = int_to_ptr.hbm [resolvable:$true] %s252_s25 }
  0x29   : > { %693 = dma.hbm_to_vmem [thread:$0]  (!%p1111_p0), %s253_s25, 64, %s255_s28, %s242_s0  }
  0x2a   : > { %s269_s29 = scalar_lea.vmem (!%p260_p3), [#allocation2], %s1129_s16 }
  0x2b   : > { %961 = dma.done.wait (%p1085_p8), %s266_s17, 128  }
  0x2c   : > { %963 = vsyncadd (%p1085_p8), %s266_s17, 4294967168  ;;  %s660_s0 = sshll.u32 %s1126_s26, 2  ;;  %s276_s25 = scalar_lea.sflag [#allocation6], %s1126_s26 }
  0x2d   : > { %s279_s9 = scalar_lea.vmem [#allocation5], %s660_s0 }
  0x2e   : > { %965 = dma.done.wait (%p1085_p8), %s276_s25, 64  }
  0x2f   : > { %967 = vsyncadd (%p1085_p8), %s276_s25, 4294967232  ;;  %v1143_v0 = vld [vmem:[%s269_s29] sm:$0xff]  ;;  %v338_v1 = vld [vmem:[%s279_s9] sm:$0xf]  ;;  %s1149_s27 = sshll.u32 %s994_s21, 3  ;;  %s1293_s5 = sld [smem:[#allocation21_spill]] }
  0x30   : > { %v1145_v2 = vunpack.c.l.bf16 %v338_v1  ;;  %v340_v3 = vand.u32 2147483647, %v1143_v0  ;;  %s326_s10 = scalar_lea.vmem [#allocation11], %s1129_s16  ;;  %s394_s15 = scalar_lea.sflag [#allocation12], %s1126_s26 }
  0x31   : > { %s448_s13 = sshll.u32 %s326_s10, 4  ;;  %s449_s13 = int_to_ptr.vmem [resolvable:$true] %s448_s13 }
  0x32   : > { %v341_v4 = vsub.f32 0.0, %v340_v3  ;;  %377 = vst [vmem:[%s326_s10] sm:$0xff] %v1145_v2 }
  0x34   : > { %v342_v5 = vmul.f32 1.442695, %v341_v4 }
  0x35   : > { %s446_s30 = scalar_lea.hbm %s1293_s5, %s1149_s27  ;;  %s844_s0 = scalar_lea.hbm %s1293_s5, 16 }
  0x36   : > { %s450_s14 = sshll.u32 %s446_s30, 4  ;;  %758 = vpow2.f32 %v342_v5  ;;  %s451_s14 = int_to_ptr.hbm [resolvable:$true] %s450_s14 }
  0x37   : > { %s838_s28 = sshra.s32 %s451_s14, 4  ;;  %s839_s28 = int_to_ptr.hbm [resolvable:$true] %s838_s28 }
  0x38   : > { %s840_s21 = scalar_lea.hbm %s839_s28, 8  ;;  %p845_p7 = scmp.lt.s32.totalorder %s839_s28, %s1293_s5 }
  0x39   : > { %p841_p4 = scmp.ne.s32.totalorder %s839_s28, %s840_s21  ;;  %p846_p8 = scmp.lt.s32.totalorder %s844_s0, %s840_s21 }
  0x3b   : > { %p842_p5 = pnand %p841_p4, %p1089_p9  ;;  %p847_p10 = por %p846_p8, %p845_p7 }
  0x3d   : > { %p843_p6 = pneg %p842_p5 }
  0x3f   : > { %p848_p13 = pnand %p847_p10, %p843_p6 }
  0x41   : > { %851 = shalt.err (!%p848_p13)
}
  0x42   : > { %682 = dma.vmem_to_hbm [thread:$0]  (%p1089_p9), %s449_s13, 128, %s451_s14, %s394_s15   ;;  %v759_v6 = vpop.eup %758  ;;  %v352_v10 = vmax.f32 %v1143_v0, 0.0  ;;  %v353_v11 = vmul.f32 %v1145_v2, %v1143_v0  ;;  %vm349_vm1 = vcmp.ge.f32.partialorder %v1143_v0, 0.0 }
  0x43   : > { %v344_v7 = vadd.f32 1.0, %v759_v6  ;;  %v358_v8 = vmul.f32 -0.5, %v759_v6  ;;  %v361_v12 = vand.u32 2147483647, %v759_v6  ;;  %s404_s30 = scalar_lea.hbm %s1275_s2, %s1149_s27  ;;  %s305_s10 = scalar_lea.vmem [#allocation7], %s1129_s16 }
  0x44   : > { %v354_v17 = vsub.f32 %v352_v10, %v353_v11  ;;  %s1176_s13 = sshll.u32 %s305_s10, 4  ;;  %s1178_s14 = sshll.u32 %s404_s30, 4  ;;  %s407_s13 = int_to_ptr.vmem [resolvable:$true] %s1176_s13  ;;  %s409_s14 = int_to_ptr.hbm [resolvable:$true] %s1178_s14 }
  0x45   : > { %760 = vrcp.f32 %v344_v7  ;;  %v359_v9 = vadd.f32 1.0, %v358_v8  ;;  %vm362_vm0 = vcmp.lt.f32.partialorder %v361_v12, 0.0004427343  ;;  %s1281_s15 = scalar_lea.vmem [#allocation10], %s1129_s16  ;;  %s418_s29 = scalar_lea.hbm %s1276_s3, %s1149_s27 }
  0x46   : > { %762 = vlog2.f32 %v344_v7  ;;  %s1183_s28 = sshll.u32 %s1281_s15, 4  ;;  %s432_s9 = scalar_lea.hbm %s1277_s4, %s1149_s27  ;;  %s435_s28 = int_to_ptr.vmem [resolvable:$true] %s1183_s28 }
  0x47   : > { %v360_v14 = vmul.f32 %v759_v6, %v359_v9  ;;  %s383_s12 = sand.u32 1, %s1065_s24   ;;  %s312_s11 = scalar_lea.vmem [#allocation8], %s1129_s16 }
  0x48   : > { %s1198_s30 = sshll.u32 %s312_s11, 4  ;;  %s1200_s15 = sshll.u32 %s418_s29, 4  ;;  %s421_s30 = int_to_ptr.vmem [resolvable:$true] %s1198_s30  ;;  %s423_s15 = int_to_ptr.hbm [resolvable:$true] %s1200_s15 }
  0x49   : > { %s1202_s21 = sshll.u32 %s432_s9, 4  ;;  %s379_s17 = scalar_lea.sflag [#allocation4], %s1126_s26  ;;  %s437_s21 = int_to_ptr.hbm [resolvable:$true] %s1202_s21 }
  0x4a   : > { %s866_s1 = sshra.s32 %s409_s14, 4  ;;  %s872_s25 = scalar_lea.hbm %s1275_s2, 16  ;;  %s867_s1 = int_to_ptr.hbm [resolvable:$true] %s866_s1 }
  0x4b   : > { %v761_v13 = vpop.eup %760  ;;  %s868_s27 = scalar_lea.hbm %s867_s1, 8  ;;  %p873_p3 = scmp.lt.s32.totalorder %s867_s1, %s1275_s2 }
  0x4c   : > { %v763_v15 = vpop.eup %762  ;;  %v346_v16 = vmul.f32 %v761_v13, %v344_v7  ;;  %p869_p0 = scmp.ne.s32.totalorder %s867_s1, %s868_s27  ;;  %p874_p4 = scmp.lt.s32.totalorder %s872_s25, %s868_s27 }
  0x4d   : > { %v357_v18 = vmul.f32 0.6931472, %v763_v15 }
  0x4e   : > { %v347_v19 = vsub.f32 2.0, %v346_v16  ;;  %p870_p1 = pnand %p869_p0, %p1089_p9  ;;  %p875_p5 = por %p874_p4, %p873_p3 }
  0x4f   : > { %v363_v20 = vsel %vm362_vm0, %v360_v14, %v357_v18 }
  0x50   : > { %v348_v21 = vmul.f32 %v761_v13, %v347_v19  ;;  %v364_v22 = vadd.f32 %v363_v20, %v354_v17  ;;  %p871_p2 = pneg %p870_p1 }
  0x52   : > { %v350_v23 = vsub.f32 1.0, %v348_v21  ;;  %368 = vst [vmem:[%s305_s10] sm:$0xff] %v364_v22  ;;  %p876_p6 = pnand %p875_p5, %p871_p2 }
  0x54   : > { %v351_v24 = vsel %vm349_vm1, %v348_v21, %v350_v23 }
  0x55   : > { %v365_v25 = vmul.f32 %v351_v24, %v1145_v2 }
  0x56   : > { %879 = shalt.err (!%p876_p6)
}
  0x57   : > { %679 = dma.vmem_to_hbm [thread:$0]  (%p1089_p9), %s407_s13, 128, %s409_s14, %s379_s17   ;;  %371 = vst [vmem:[%s312_s11] sm:$0xff] %v365_v25 }
  0x58   : > { %s1294_s26 = scalar_lea.vmem [#allocation10], %s1129_s16  ;;  %s384_s1 = scalar_lea.sflag [#allocation9], %s383_s12 }
  0x59   : > { %374 = vst [vmem:[%s1294_s26] sm:$0xff] %v351_v24  ;;  %s894_s5 = sshra.s32 %s423_s15, 4  ;;  %s900_s24 = scalar_lea.hbm %s1276_s3, 16  ;;  %s895_s5 = int_to_ptr.hbm [resolvable:$true] %s894_s5 }
  0x5a   : > { %s896_s29 = scalar_lea.hbm %s895_s5, 8  ;;  %p901_p13 = scmp.lt.s32.totalorder %s895_s5, %s1276_s3 }
  0x5b   : > { %p897_p7 = scmp.ne.s32.totalorder %s895_s5, %s896_s29  ;;  %p902_p0 = scmp.lt.s32.totalorder %s900_s24, %s896_s29 }
  0x5d   : > { %p898_p8 = pnand %p897_p7, %p1089_p9  ;;  %p903_p1 = por %p902_p0, %p901_p13 }
  0x5f   : > { %p899_p10 = pneg %p898_p8 }
  0x61   : > { %p904_p2 = pnand %p903_p1, %p899_p10 }
  0x63   : > { %907 = shalt.err (!%p904_p2)
}
  0x64   : > { %680 = dma.vmem_to_hbm [thread:$0]  (%p1089_p9), %s421_s30, 128, %s423_s15, %s384_s1  }
  0x65   : > { %s922_s14 = sshra.s32 %s437_s21, 4  ;;  %s928_s0 = scalar_lea.hbm %s1277_s4, 16  ;;  %s923_s14 = int_to_ptr.hbm [resolvable:$true] %s922_s14 }
  0x66   : > { %s924_s12 = scalar_lea.hbm %s923_s14, 8  ;;  %p929_p6 = scmp.lt.s32.totalorder %s923_s14, %s1277_s4 }
  0x67   : > { %p925_p3 = scmp.ne.s32.totalorder %s923_s14, %s924_s12  ;;  %p930_p7 = scmp.lt.s32.totalorder %s928_s0, %s924_s12 }
  0x69   : > { %p926_p4 = pnand %p925_p3, %p1089_p9  ;;  %p931_p8 = por %p930_p7, %p929_p6 }
  0x6b   : > { %p927_p5 = pneg %p926_p4 }
  0x6d   : > { %p932_p10 = pnand %p931_p8, %p927_p5 }
  0x6f   : > { %935 = shalt.err (!%p932_p10)
}
  0x70   : > { %681 = dma.vmem_to_hbm [thread:$0]  (%p1089_p9), %s435_s28, 128, %s437_s21, %s384_s1  }
  0x71 PF: > { %s462_s15 = sand.u32 1, %s982_s18   ;;  %p695_p13 = pnand %p653_p12, %p1098_p11 }
  0x72   : > { %s463_s30 = scalar_lea.sflag [#allocation4], %s462_s15 }
  0x73   : > { %p696_p0 = pneg %p695_p13 }
  0x75   : > { %969 = dma.done.wait (%p696_p0), %s463_s30, 128  }
  0x76   : > { %971 = vsyncadd (%p696_p0), %s463_s30, 4294967168  ;;  %s1295_s26 = sadd.s32 4294967294, %s1002_s23  }
  0x77   : > { %s472_s6 = sand.u32 1, %s1295_s26  }
  0x78   : > { %s473_s5 = scalar_lea.sflag [#allocation9], %s472_s6 }
  0x79   : > { %973 = dma.done.wait (%p696_p0), %s473_s5, 256  }
  0x7a   : > { %975 = vsyncadd (%p696_p0), %s473_s5, 4294967040  ;;  %s493_s29 = scalar_lea.sflag [#allocation12], %s462_s15 }
  0x7b   : > { %977 = dma.done.wait (%p696_p0), %s493_s29, 128  }
  0x7c   : > { %979 = vsyncadd (%p696_p0), %s493_s29, 4294967168  ;;  %s31_s23 = sadd.s32 1, %s1002_s23   ;;  %s1296_s8 = sld [smem:[#allocation18_spill]] }
  0x7d   : > { %p28_p9 = scmp.ge.s32.totalorder %s31_s23, 4   ;;  %s1297_s18 = smov %s986_s19 }
  0x7e   : > { %s1298_s19 = smov %s990_s20  ;;  %s1299_s20 = smov %s1096_s7 }
  0x7f   : > { %s1300_s21 = smov %s998_s22  ;;  %30 = sbr.rel (!%p28_p9) target bundleno = 16 (0x10), region = 139 }
  0x82   : > { %s1301_s22 = smov %s1296_s8 }
  0x84   :  { %499 = vsyncpa [#allocation3], 1 }
  0x85   :  { %501 = vsyncpa [#allocation3 + $0x1], 1 }
  0x86   :  { %502 = vsyncpa [#allocation6], 1 }
  0x87   :  { %504 = vsyncpa [#allocation6 + $0x1], 1 }
  0x88   :  { %505 = vsyncpa [#allocation4], 1 }
  0x89   :  { %507 = vsyncpa [#allocation4 + $0x1], 1 }
  0x8a   :  { %508 = vsyncpa [#allocation9], 1 }
  0x8b   :  { %510 = vsyncpa [#allocation9 + $0x1], 1 }
  0x8c   :  { %511 = vsyncpa [#allocation12], 1 }
  0x8d   :  { %513 = vsyncpa [#allocation12 + $0x1], 1 }

</bundles_post_ra>
